<compile_context>
chip_gen: v7x
topology: tpu7x:2x2x1
jax: 0.10.0
libtpu: 0.0.40
codegen_flags: <defaults>
</compile_context>

<pallas_src>
import jax
import jax.numpy as jnp
from jax.experimental import pallas as pl
from jax.experimental.pallas import tpu as pltpu


def _round_up(x, m):
    return ((x + m - 1) // m) * m


def _block_footprint_bytes(th, H, W, F, out_elt, in_elt):
    """Padded VMEM bytes of one grid step's blocks, incl. x2 double buffering."""
    w_pad = _round_up(W, 128)
    th_pad = _round_up(min(th, H), 8)
    col_bytes = _round_up(F, 8) * w_pad * in_elt          # (F, W) block
    row_bytes = th_pad * _round_up(F, 128) * in_elt       # (TH, F) block, lane-dense
    out_bytes = 2 * F * th_pad * w_pad * out_elt          # (2F, TH, W) block
    return 2 * (col_bytes + row_bytes + out_bytes)


def _pick_h_tile(H, W, F, out_elt, in_elt, budget_bytes, min_steps):
    """Largest legal H tile whose double-buffered blocks fit `budget_bytes`, then
    shrunk to a balanced split if needed to give at least `min_steps` grid steps."""
    step = 16 if out_elt < 4 else 8       # keep sub-32-bit tiles on the (16,128) granule
    if H <= step:
        return H

    def fits(th):
        return _block_footprint_bytes(th, H, W, F, out_elt, in_elt) <= budget_bytes

    th = H if fits(H) else step
    if th != H:
        for t in range((H // step) * step, step - 1, -step):
            if fits(t):
                th = t
                break
    if -(-H // th) < min_steps:           # balanced split, not a mostly-padded last tile
        th = min(th, _round_up(-(-H // min_steps), step))
    return max(step, min(th, H))


def _pos_embed_kernel(col_ref, row_ref, out_ref):
    # col_ref: (F, W)        column-embedding table, transposed (constant across grid)
    # row_ref: (TH, F)       row-embedding rows for this H tile (lane-dense, F last)
    # out_ref: (2F, TH, W)   channels-first output tile for one batch element
    F, W = col_ref.shape
    TH = row_ref.shape[0]
    # channels [0, F): col embedding, constant along H  -> sublane broadcast
    out_ref[0:F, :, :] = jnp.broadcast_to(col_ref[...][:, None, :], (F, TH, W))
    # channels [F, 2F): row embedding, constant along W -> tiny in-kernel transpose
    # (<= 50 x F elements) followed by a lane broadcast
    row_t = jnp.transpose(row_ref[...])                        # (F, TH)
    out_ref[F:, :, :] = jnp.broadcast_to(row_t[:, :, None], (F, TH, W))


def position_embedding_learned(x, row_embed_weight, col_embed_weight, *, out_dtype=None):
    """x: (B, C, H, W); *_embed_weight: (50, F). Returns (B, 2F, H, W)."""
    B = x.shape[0]
    H, W = x.shape[-2], x.shape[-1]
    F = row_embed_weight.shape[-1]
    assert H <= row_embed_weight.shape[0], "H exceeds row_embed table size (50)"
    assert W <= col_embed_weight.shape[0], "W exceeds col_embed table size (50)"

    out_dtype = jnp.dtype(row_embed_weight.dtype if out_dtype is None else out_dtype)
    out_elt = out_dtype.itemsize
    in_elt = out_elt  # tables are cast to the output dtype below

    # Embedding lookup with arange indices is a plain leading slice; the col transpose
    # is on a tiny (<=50, F) table -- glue, not hot path.
    col_fw = jnp.transpose(col_embed_weight[:W]).astype(out_dtype)   # (F, W)
    row_hf = row_embed_weight[:H].astype(out_dtype)                  # (H, F), lane-dense

    # H tile: largest that fits a conservative double-buffered VMEM budget (stays under
    # v5e's 16 MiB default scoped limit). If there is no batch axis to shard, force >=2
    # H steps so v7x's second TensorCore is used.
    budget = 10 << 20
    min_h_steps = 1 if B >= 2 else 2
    TH = _pick_h_tile(H, W, F, out_elt, in_elt, budget, min_h_steps)
    n_h = pl.cdiv(H, TH)

    footprint = _block_footprint_bytes(TH, H, W, F, out_elt, in_elt)
    vmem_limit = int(min(48 << 20, max(16 << 20, 2 * footprint + (4 << 20))))

    out_bytes = B * 2 * F * H * W * out_elt
    cost = pl.CostEstimate(
        flops=0, transcendentals=0,
        bytes_accessed=out_bytes + (F * W + H * F) * in_elt)

    return pl.pallas_call(
        _pos_embed_kernel,
        out_shape=jax.ShapeDtypeStruct((B, 2 * F, H, W), out_dtype),
        grid=(n_h, B),                                    # b varies fastest: row/col block
        in_specs=[                                        # indices unchanged -> no re-DMA
            pl.BlockSpec((F, W), lambda i, b: (0, 0)),    # constant col table
            pl.BlockSpec((TH, F), lambda i, b: (i, 0)),   # lane-dense row tile
        ],
        out_specs=pl.BlockSpec((pl.Squeezed(), 2 * F, TH, W),
                               lambda i, b: (b, 0, i, 0)),
        compiler_params=pltpu.CompilerParams(
            dimension_semantics=("parallel", "parallel"),
            vmem_limit_bytes=vmem_limit),
        cost_estimate=cost,
    )(col_fw, row_hf)


def _reference(x, row_w, col_w):
    H, W = x.shape[-2], x.shape[-1]
    x_emb = col_w[:W]                                    # (W, F)
    y_emb = row_w[:H]                                    # (H, F)
    pos = jnp.concatenate(
        [jnp.broadcast_to(x_emb[None, :, :], (H, W, x_emb.shape[-1])),
         jnp.broadcast_to(y_emb[:, None, :], (H, W, y_emb.shape[-1]))],
        axis=-1)                                         # (H, W, 2F)
    pos = jnp.transpose(pos, (2, 0, 1))[None]            # (1, 2F, H, W)
    return jnp.broadcast_to(pos, (x.shape[0],) + pos.shape[1:])


if __name__ == "__main__":
    key = jax.random.PRNGKey(0)
    k_x, k_row, k_col = jax.random.split(key, 3)

    B, C, H, W = 2, 4, 16, 16
    num_pos_feats = 32  # module default is 256; small shapes for the demo

    x = jax.random.normal(k_x, (B, C, H, W), dtype=jnp.float32)
    # nn.init.uniform_ -> U[0, 1)
    row_embed_weight = jax.random.uniform(k_row, (50, num_pos_feats), dtype=jnp.float32)
    col_embed_weight = jax.random.uniform(k_col, (50, num_pos_feats), dtype=jnp.float32)

    pos = position_embedding_learned(x, row_embed_weight, col_embed_weight)
    pos = jax.block_until_ready(pos)

    ref = _reference(x, row_embed_weight, col_embed_weight)
    assert pos.shape == (B, 2 * num_pos_feats, H, W), pos.shape
    assert pos.dtype == jnp.float32, pos.dtype
    assert jnp.allclose(pos, ref), "mismatch vs. pure-JAX reference"

    print("KERNEL_OK")
</pallas_src>

<mosaic_0001>
module attributes {stable_mosaic.version = 11 : i64} {
  func.func @_pos_embed_kernel(%arg0: i32, %arg1: i32, %arg2: memref<32x16xf32, #tpu.memory_space<vmem>>, %arg3: memref<16x32xf32, #tpu.memory_space<vmem>>, %arg4: memref<1x64x16x16xf32, #tpu.memory_space<vmem>>) attributes {dimension_semantics = [#tpu.dimension_semantics<parallel>, #tpu.dimension_semantics<parallel>], iteration_bounds = array<i64: 1, 2>, scalar_prefetch = 0 : i64, scratch_operands = 0 : i64, tpu.core_type = #tpu.core_type<tc>, window_params = [{pipeline_mode = #tpu.pipeline_mode<synchronous>, transform_indices = @transform_0, window_bounds = array<i64: 32, 16>}, {transform_indices = @transform_1, window_bounds = array<i64: 16, 32>}, {transform_indices = @transform_2, window_bounds = array<i64: 1, 64, 16, 16>}]} {
    %c0 = arith.constant 0 : index
    %c0_0 = arith.constant 0 : index
    %0 = vector.load %arg2[%c0, %c0_0] : memref<32x16xf32, #tpu.memory_space<vmem>>, vector<32x16xf32>
    %1 = vector.shape_cast %0 : vector<32x16xf32> to vector<32x1x16xf32>
    %2 = vector.shape_cast %1 : vector<32x1x16xf32> to vector<32x1x16xf32>
    %3 = vector.broadcast %2 : vector<32x1x16xf32> to vector<32x16x16xf32>
    %c0_1 = arith.constant 0 : index
    %c0_2 = arith.constant 0 : index
    %c0_3 = arith.constant 0 : index
    %c0_4 = arith.constant 0 : index
    %4 = vector.load %arg4[%c0_1, %c0_2, %c0_3, %c0_4] : memref<1x64x16x16xf32, #tpu.memory_space<vmem>>, vector<1x32x16x16xf32>
    %5 = vector.shape_cast %4 : vector<1x32x16x16xf32> to vector<32x16x16xf32>
    %6 = vector.shape_cast %3 : vector<32x16x16xf32> to vector<1x32x16x16xf32>
    tpu.vector_store %arg4[%c0_1, %c0_2, %c0_3, %c0_4], %6 {strides = array<i32>} : memref<1x64x16x16xf32, #tpu.memory_space<vmem>>, vector<1x32x16x16xf32>,
    %c0_5 = arith.constant 0 : index
    %c0_6 = arith.constant 0 : index
    %7 = vector.load %arg3[%c0_5, %c0_6] : memref<16x32xf32, #tpu.memory_space<vmem>>, vector<16x32xf32>
    %8 = tpu.transpose %7, [1, 0] : vector<16x32xf32> -> vector<32x16xf32>
    %9 = vector.shape_cast %8 : vector<32x16xf32> to vector<32x16x1xf32>
    %10 = vector.shape_cast %9 : vector<32x16x1xf32> to vector<32x16x1xf32>
    %11 = vector.broadcast %10 : vector<32x16x1xf32> to vector<32x16x16xf32>
    %c0_7 = arith.constant 0 : index
    %c32 = arith.constant 32 : index
    %c0_8 = arith.constant 0 : index
    %c0_9 = arith.constant 0 : index
    %12 = vector.load %arg4[%c0_7, %c32, %c0_8, %c0_9] : memref<1x64x16x16xf32, #tpu.memory_space<vmem>>, vector<1x32x16x16xf32>
    %13 = vector.shape_cast %12 : vector<1x32x16x16xf32> to vector<32x16x16xf32>
    %14 = vector.shape_cast %11 : vector<32x16x16xf32> to vector<1x32x16x16xf32>
    tpu.vector_store %arg4[%c0_7, %c32, %c0_8, %c0_9], %14 {strides = array<i32>} : memref<1x64x16x16xf32, #tpu.memory_space<vmem>>, vector<1x32x16x16xf32>,
    return
  }
  func.func @transform_0(%arg0: i32, %arg1: i32) -> (i32, i32) {
    %c0_i32 = arith.constant 0 : i32
    %c0_i32_0 = arith.constant 0 : i32
    %c0_i32_1 = arith.constant 0 : i32
    return %c0_i32, %c0_i32_0 : i32, i32
  }
  func.func @transform_1(%arg0: i32, %arg1: i32) -> (i32, i32) {
    %c0_i32 = arith.constant 0 : i32
    %c0_i32_0 = arith.constant 0 : i32
    return %arg0, %c0_i32 : i32, i32
  }
  func.func @transform_2(%arg0: i32, %arg1: i32) -> (i32, i32, i32, i32) {
    %c0_i32 = arith.constant 0 : i32
    %c0_i32_0 = arith.constant 0 : i32
    %c0_i32_1 = arith.constant 0 : i32
    return %arg1, %c0_i32, %arg0, %c0_i32_0 : i32, i32, i32, i32
  }
}

</mosaic_0001>

<bundles_post_ra>
// kernel: tpu_custom_call.1
= control target key start
LH: loop header
LB: loop body
LE: loop exit
PB: predicated region body
PF: predicated region fallthrough
CT: control target
= control target key end

     0   :  { %s1277_s9 = smov 0   ;;  %s1279_s10 = smov 0   ;;  %s1692_s0 = inlined_call_operand.vmem [shape: f32[32,16], index: 0, kind: input, shape index: {}]   ;;  %s1693_s1 = inlined_call_operand.vmem [shape: f32[16,32], index: 1, kind: input, shape index: {}]   ;;  %s1694_s2 = inlined_call_operand.vmem [shape: f32[2,64,16,16], index: 2, kind: output, shape index: {}]  }
   0x1   :  { %s1281_s11 = smov 0  }
   0x2 LB: > { %s21_s12 = sadd.s32 1, %s1255_s10  ;;  %p1137_p0 = scmp.ge.s32.totalorder %s1259_s11, 1  ;;  %s1259_s11 = sphi %s1281_s11, %s12_s11   ;;  %s1255_s10 = sphi %s1279_s10, %s1696_s10   ;;  %s1251_s9 = sphi %s1277_s9, %s1695_s9  }
   0x3   : > { %p22_p1 = scmp.ge.s32.totalorder %s21_s12, 2  ;;  %p127_p2 = scmp.lt.s32.totalorder %s1259_s11, 3 }
   0x5   : > { %s1698_s12 = smov (%p22_p1, %s21_s12), 0  ;;  %p128_p3 = pnand %p1137_p0, %p127_p2 }
   0x6   : > { %v598_v0 = vld [vmem:[%s1693_s1] sm:$0xff] (!%p128_p3)  ;;  %v599_v1 = vld [vmem:[%s1693_s1 + $0x8] sm:$0xff] (!%p128_p3)  ;;  %v181_v2 = vlaneseq (!%p128_p3)  ;;  %v171_v5 = vld [vmem:[%s1692_s0 + $0x10] sm:$0xff] (!%p128_p3)  ;;  %v1261_v7 = vmov (!%p128_p3), 1966171168   ;;  %p160_p4 = scmp.lt.s32.totalorder (!%p128_p3), %s1251_s9, 1 }
   0x7   : > { %131 = sbr.rel (%p128_p3) target bundleno = 406 (0x196), region = 28  ;;  %600 = vxpose.xlu0.b32.start [1/2] (short) (narrow) (!%p128_p3), %v598_v0, 32  ;;  %v169_v3 = vld [vmem:[%s1692_s0] sm:$0xff] (!%p128_p3)  ;;  %v170_v4 = vld [vmem:[%s1692_s0 + $0x8] sm:$0xff] (!%p128_p3)  ;;  %v172_v6 = vld [vmem:[%s1692_s0 + $0x18] sm:$0xff] (!%p128_p3)  ;;  %v179_v8 = vunpack.c.l.s4 (!%p128_p3), %v1261_v7  ;;  %v275_v13 = vcombine.high (!%p128_p3), %v171_v5, %v171_v5  ;;  %vm533_vm0 = vcmask (!%p128_p3), 130048  }
   0x8   : > { %v1315_v9 = vshrl.u32 (!%p128_p3), %v181_v2, 7  ;;  %v177_v10 = vcombine.high (!%p128_p3), %v169_v3, %v169_v3  ;;  %v226_v12 = vcombine.high (!%p128_p3), %v170_v4, %v170_v4  ;;  %v324_v14 = vcombine.high (!%p128_p3), %v172_v6, %v172_v6 }
   0x9   : > { %v180_v11 = vunpack.c.0.s8 (!%p128_p3), %v179_v8 }
   0xa   : > { %v1319_v16 = vsub.s32 (!%p128_p3), 0, %v1315_v9 }
   0xb   : > { %601 = vxpose.xlu0.b32.end [2/2] (short) (narrow) (!%p128_p3), %v599_v1, 32  ;;  %v183_v15 = vsub.s32 (!%p128_p3), %v180_v11, %v1315_v9 }
   0xd   : > { %v184_v17 = vrot.slane (!%p128_p3), %v169_v3, %v183_v15  ;;  %v191_v18 = vrot.slane (!%p128_p3), %v177_v10, %v183_v15  ;;  %v233_v19 = vrot.slane (!%p128_p3), %v170_v4, %v183_v15  ;;  %v240_v20 = vrot.slane (!%p128_p3), %v226_v12, %v183_v15 }
   0xe   : > { %v282_v21 = vrot.slane %v171_v5, %v183_v15  ;;  %v289_v22 = vrot.slane %v275_v13, %v183_v15  ;;  %v331_v23 = vrot.slane %v172_v6, %v183_v15  ;;  %v338_v24 = vrot.slane %v324_v14, %v183_v15  ;;  %s1700_s9 = smov (!%p160_p4, %s1251_s9), 1 }
   0xf   : > { %v192_v25 = vcombine.high %v184_v17, %v184_v17  ;;  %v193_v26 = vcombine.high %v191_v18, %v191_v18  ;;  %v200_v27 = vrot.slane %v184_v17, %v183_v15  ;;  %v207_v28 = vrot.slane %v191_v18, %v183_v15  ;;  %s1206_s25 = sshll.u32 %s1700_s9, 10 }
  0x10   : > { %v241_v29 = vcombine.high %v233_v19, %v233_v19  ;;  %v242_v30 = vcombine.high %v240_v20, %v240_v20  ;;  %v249_v31 = vrot.slane %v233_v19, %v183_v15  ;;  %v256_v32 = vrot.slane %v240_v20, %v183_v15  ;;  %s1353_s28 = scalar_lea.vmem %s1694_s2, %s1206_s25 }
  0x11   : > { %v214_v33 = vrot.slane %v192_v25, %v183_v15  ;;  %v221_v34 = vrot.slane %v193_v26, %v183_v15  ;;  %v222_v35 = vcombine.high %v200_v27, %v200_v27  ;;  %v223_v36 = vcombine.high %v207_v28, %v207_v28 }
  0x12   : > { %v263_v37 = vrot.slane %v241_v29, %v183_v15  ;;  %v270_v38 = vrot.slane %v242_v30, %v183_v15  ;;  %v271_v39 = vcombine.high %v249_v31, %v249_v31  ;;  %v272_v40 = vcombine.high %v256_v32, %v256_v32 }
  0x13   : > { %v224_v41 = vcombine.high %v214_v33, %v214_v33  ;;  %v225_v42 = vcombine.high %v221_v34, %v221_v34  ;;  %v290_v43 = vcombine.high %v282_v21, %v282_v21  ;;  %v291_v44 = vcombine.high %v289_v22, %v289_v22 }
  0x14   : > { %v273_v45 = vcombine.high %v263_v37, %v263_v37  ;;  %v274_v46 = vcombine.high %v270_v38, %v270_v38  ;;  %v298_v47 = vrot.slane %v282_v21, %v183_v15  ;;  %v1327_v48 = vrot.slane %v289_v22, %v183_v15 }
  0x15   : > { %v312_v49 = vrot.slane %v290_v43, %v183_v15  ;;  %v1329_v50 = vrot.slane %v291_v44, %v183_v15  ;;  %v339_v51 = vcombine.high %v331_v23, %v331_v23  ;;  %v340_v52 = vcombine.high %v338_v24, %v338_v24 }
  0x16   : > { %v320_v53 = vcombine.high %v298_v47, %v298_v47  ;;  %v321_v54 = vcombine.high %v1327_v48, %v1327_v48  ;;  %v1334_v55 = vrot.slane %v331_v23, %v183_v15  ;;  %v1336_v56 = vrot.slane %v338_v24, %v183_v15 }
  0x17   : > { %v322_v57 = vcombine.high %v312_v49, %v312_v49  ;;  %v323_v58 = vcombine.high %v1329_v50, %v1329_v50  ;;  %v1340_v59 = vrot.slane %v339_v51, %v183_v15  ;;  %v1342_v60 = vrot.slane %v340_v52, %v183_v15 }
  0x18   : > { %v369_v61 = vcombine.high %v1334_v55, %v1334_v55  ;;  %v370_v62 = vcombine.high %v1336_v56, %v1336_v56  ;;  %v376_v63 = vrot.slane %v200_v27, %v1319_v16  ;;  %v380_v0 = vrot.slane %v214_v33, %v1319_v16 }
  0x19   : > { %v371_v1 = vcombine.high %v1340_v59, %v1340_v59  ;;  %v372_v2 = vcombine.high %v1342_v60, %v1342_v60  ;;  %v384_v3 = vrot.slane %v222_v35, %v1319_v16  ;;  %v388_v4 = vrot.slane %v224_v41, %v1319_v16 }
  0x1a   : > { %v392_v5 = vrot.slane %v207_v28, %v1319_v16  ;;  %v396_v6 = vrot.slane %v221_v34, %v1319_v16  ;;  %v400_v7 = vrot.slane %v223_v36, %v1319_v16  ;;  %v404_v8 = vrot.slane %v225_v42, %v1319_v16  ;;  %534 = vst.msk [vmem:[%s1353_s28] sm:$0xff] %vm533_vm0, %v376_v63 }
  0x1b   : > { %535 = vst.msk [vmem:[%s1353_s28 + $0x8] sm:$0xff] %vm533_vm0, %v376_v63  ;;  %536 = vst.msk [vmem:[%s1353_s28 + $0x10] sm:$0xff] %vm533_vm0, %v380_v0  ;;  %v408_v10 = vrot.slane %v249_v31, %v1319_v16  ;;  %v412_v11 = vrot.slane %v263_v37, %v1319_v16  ;;  %v416_v12 = vrot.slane %v271_v39, %v1319_v16  ;;  %v1533_v35 = vsub.s32 1, %v1315_v9 }
  0x1c   : > { %537 = vst.msk [vmem:[%s1353_s28 + $0x18] sm:$0xff] %vm533_vm0, %v380_v0  ;;  %v420_v13 = vrot.slane %v273_v45, %v1319_v16  ;;  %538 = vst.msk [vmem:[%s1353_s28 + $0x20] sm:$0xff] %vm533_vm0, %v384_v3  ;;  %v424_v14 = vrot.slane %v256_v32, %v1319_v16  ;;  %v428_v15 = vrot.slane %v270_v38, %v1319_v16  ;;  %v1540_v42 = vsub.s32 2, %v1315_v9 }
  0x1d   : > { %539 = vst.msk [vmem:[%s1353_s28 + $0x28] sm:$0xff] %vm533_vm0, %v384_v3  ;;  %540 = vst.msk [vmem:[%s1353_s28 + $0x30] sm:$0xff] %vm533_vm0, %v388_v4  ;;  %v432_v17 = vrot.slane %v272_v40, %v1319_v16  ;;  %v436_v18 = vrot.slane %v274_v46, %v1319_v16  ;;  %v440_v19 = vrot.slane %v298_v47, %v1319_v16  ;;  %v667_v45 = vsub.s32 3, %v1315_v9 }
  0x1e   : > { %541 = vst.msk [vmem:[%s1353_s28 + $0x38] sm:$0xff] %vm533_vm0, %v388_v4  ;;  %542 = vst.msk [vmem:[%s1353_s28 + $0x40] sm:$0xff] %vm533_vm0, %v392_v5  ;;  %v444_v20 = vrot.slane %v312_v49, %v1319_v16  ;;  %v448_v21 = vrot.slane %v320_v53, %v1319_v16  ;;  %v452_v22 = vrot.slane %v322_v57, %v1319_v16  ;;  %v678_v47 = vsub.s32 4, %v1315_v9 }
  0x1f   : > { %543 = vst.msk [vmem:[%s1353_s28 + $0x48] sm:$0xff] %vm533_vm0, %v392_v5  ;;  %544 = vst.msk [vmem:[%s1353_s28 + $0x50] sm:$0xff] %vm533_vm0, %v396_v6  ;;  %v456_v23 = vrot.slane %v1327_v48, %v1319_v16  ;;  %v460_v24 = vrot.slane %v1329_v50, %v1319_v16  ;;  %v464_v25 = vrot.slane %v321_v54, %v1319_v16  ;;  %v689_v50 = vsub.s32 5, %v1315_v9 }
  0x20   : > { %545 = vst.msk [vmem:[%s1353_s28 + $0x58] sm:$0xff] %vm533_vm0, %v396_v6  ;;  %546 = vst.msk [vmem:[%s1353_s28 + $0x60] sm:$0xff] %vm533_vm0, %v400_v7  ;;  %v468_v26 = vrot.slane %v323_v58, %v1319_v16  ;;  %v472_v27 = vrot.slane %v1334_v55, %v1319_v16  ;;  %v476_v28 = vrot.slane %v1340_v59, %v1319_v16  ;;  %v700_v52 = vsub.s32 6, %v1315_v9 }
  0x21   : > { %547 = vst.msk [vmem:[%s1353_s28 + $0x68] sm:$0xff] %vm533_vm0, %v400_v7  ;;  %548 = vst.msk [vmem:[%s1353_s28 + $0x70] sm:$0xff] %vm533_vm0, %v404_v8  ;;  %v480_v29 = vrot.slane %v369_v61, %v1319_v16  ;;  %v484_v30 = vrot.slane %v371_v1, %v1319_v16  ;;  %v488_v31 = vrot.slane %v1336_v56, %v1319_v16  ;;  %v711_v55 = vsub.s32 7, %v1315_v9 }
  0x22   : > { %549 = vst.msk [vmem:[%s1353_s28 + $0x78] sm:$0xff] %vm533_vm0, %v404_v8  ;;  %550 = vst.msk [vmem:[%s1353_s28 + $0x80] sm:$0xff] %vm533_vm0, %v408_v10  ;;  %v492_v32 = vrot.slane %v1342_v60, %v1319_v16  ;;  %v496_v33 = vrot.slane %v370_v62, %v1319_v16  ;;  %v500_v34 = vrot.slane %v372_v2, %v1319_v16 }
  0x23   : > { %551 = vst.msk [vmem:[%s1353_s28 + $0x88] sm:$0xff] %vm533_vm0, %v408_v10  ;;  %552 = vst.msk [vmem:[%s1353_s28 + $0x90] sm:$0xff] %vm533_vm0, %v412_v11 }
  0x24   : > { %553 = vst.msk [vmem:[%s1353_s28 + $0x98] sm:$0xff] %vm533_vm0, %v412_v11  ;;  %554 = vst.msk [vmem:[%s1353_s28 + $0xa0] sm:$0xff] %vm533_vm0, %v416_v12 }
  0x25   : > { %555 = vst.msk [vmem:[%s1353_s28 + $0xa8] sm:$0xff] %vm533_vm0, %v416_v12  ;;  %556 = vst.msk [vmem:[%s1353_s28 + $0xb0] sm:$0xff] %vm533_vm0, %v420_v13 }
  0x26   : > { %557 = vst.msk [vmem:[%s1353_s28 + $0xb8] sm:$0xff] %vm533_vm0, %v420_v13  ;;  %558 = vst.msk [vmem:[%s1353_s28 + $0xc0] sm:$0xff] %vm533_vm0, %v424_v14 }
  0x27   : > { %559 = vst.msk [vmem:[%s1353_s28 + $0xc8] sm:$0xff] %vm533_vm0, %v424_v14  ;;  %560 = vst.msk [vmem:[%s1353_s28 + $0xd0] sm:$0xff] %vm533_vm0, %v428_v15 }
  0x28   : > { %561 = vst.msk [vmem:[%s1353_s28 + $0xd8] sm:$0xff] %vm533_vm0, %v428_v15  ;;  %562 = vst.msk [vmem:[%s1353_s28 + $0xe0] sm:$0xff] %vm533_vm0, %v432_v17 }
  0x29   : > { %563 = vst.msk [vmem:[%s1353_s28 + $0xe8] sm:$0xff] %vm533_vm0, %v432_v17  ;;  %564 = vst.msk [vmem:[%s1353_s28 + $0xf0] sm:$0xff] %vm533_vm0, %v436_v18 }
  0x2a   : > { %565 = vst.msk [vmem:[%s1353_s28 + $0xf8] sm:$0xff] %vm533_vm0, %v436_v18  ;;  %566 = vst.msk [vmem:[%s1353_s28 + $0x100] sm:$0xff] %vm533_vm0, %v440_v19 }
  0x2b   : > { %567 = vst.msk [vmem:[%s1353_s28 + $0x108] sm:$0xff] %vm533_vm0, %v440_v19  ;;  %568 = vst.msk [vmem:[%s1353_s28 + $0x110] sm:$0xff] %vm533_vm0, %v444_v20 }
  0x2c   : > { %569 = vst.msk [vmem:[%s1353_s28 + $0x118] sm:$0xff] %vm533_vm0, %v444_v20  ;;  %570 = vst.msk [vmem:[%s1353_s28 + $0x120] sm:$0xff] %vm533_vm0, %v448_v21 }
  0x2d   : > { %571 = vst.msk [vmem:[%s1353_s28 + $0x128] sm:$0xff] %vm533_vm0, %v448_v21  ;;  %572 = vst.msk [vmem:[%s1353_s28 + $0x130] sm:$0xff] %vm533_vm0, %v452_v22 }
  0x2e   : > { %573 = vst.msk [vmem:[%s1353_s28 + $0x138] sm:$0xff] %vm533_vm0, %v452_v22  ;;  %574 = vst.msk [vmem:[%s1353_s28 + $0x140] sm:$0xff] %vm533_vm0, %v456_v23 }
  0x2f   : > { %575 = vst.msk [vmem:[%s1353_s28 + $0x148] sm:$0xff] %vm533_vm0, %v456_v23  ;;  %576 = vst.msk [vmem:[%s1353_s28 + $0x150] sm:$0xff] %vm533_vm0, %v460_v24 }
  0x30   : > { %577 = vst.msk [vmem:[%s1353_s28 + $0x158] sm:$0xff] %vm533_vm0, %v460_v24  ;;  %578 = vst.msk [vmem:[%s1353_s28 + $0x160] sm:$0xff] %vm533_vm0, %v464_v25 }
  0x31   : > { %579 = vst.msk [vmem:[%s1353_s28 + $0x168] sm:$0xff] %vm533_vm0, %v464_v25  ;;  %580 = vst.msk [vmem:[%s1353_s28 + $0x170] sm:$0xff] %vm533_vm0, %v468_v26 }
  0x32   : > { %581 = vst.msk [vmem:[%s1353_s28 + $0x178] sm:$0xff] %vm533_vm0, %v468_v26  ;;  %582 = vst.msk [vmem:[%s1353_s28 + $0x180] sm:$0xff] %vm533_vm0, %v472_v27 }
  0x33   : > { %583 = vst.msk [vmem:[%s1353_s28 + $0x188] sm:$0xff] %vm533_vm0, %v472_v27  ;;  %584 = vst.msk [vmem:[%s1353_s28 + $0x190] sm:$0xff] %vm533_vm0, %v476_v28 }
  0x34   : > { %585 = vst.msk [vmem:[%s1353_s28 + $0x198] sm:$0xff] %vm533_vm0, %v476_v28  ;;  %586 = vst.msk [vmem:[%s1353_s28 + $0x1a0] sm:$0xff] %vm533_vm0, %v480_v29 }
  0x35   : > { %587 = vst.msk [vmem:[%s1353_s28 + $0x1a8] sm:$0xff] %vm533_vm0, %v480_v29  ;;  %588 = vst.msk [vmem:[%s1353_s28 + $0x1b0] sm:$0xff] %vm533_vm0, %v484_v30 }
  0x36   : > { %589 = vst.msk [vmem:[%s1353_s28 + $0x1b8] sm:$0xff] %vm533_vm0, %v484_v30  ;;  %590 = vst.msk [vmem:[%s1353_s28 + $0x1c0] sm:$0xff] %vm533_vm0, %v488_v31 }
  0x37   : > { %591 = vst.msk [vmem:[%s1353_s28 + $0x1c8] sm:$0xff] %vm533_vm0, %v488_v31  ;;  %592 = vst.msk [vmem:[%s1353_s28 + $0x1d0] sm:$0xff] %vm533_vm0, %v492_v32 }
  0x38   : > { %593 = vst.msk [vmem:[%s1353_s28 + $0x1d8] sm:$0xff] %vm533_vm0, %v492_v32  ;;  %594 = vst.msk [vmem:[%s1353_s28 + $0x1e0] sm:$0xff] %vm533_vm0, %v496_v33 }
  0x39   : > { %595 = vst.msk [vmem:[%s1353_s28 + $0x1e8] sm:$0xff] %vm533_vm0, %v496_v33  ;;  %596 = vst.msk [vmem:[%s1353_s28 + $0x1f0] sm:$0xff] %vm533_vm0, %v500_v34 }
  0x3a   : > { %597 = vst.msk [vmem:[%s1353_s28 + $0x1f8] sm:$0xff] %vm533_vm0, %v500_v34 }
  0x87   : > { %v616_v36 = vpop.trf.xlu0 }
  0x88   : > { %v646_v37 = vrot.slane %v616_v36, %v1533_v35  ;;  %v635_v38 = vrot.slane %v616_v36, %v1319_v16  ;;  %v657_v44 = vrot.slane %v616_v36, %v1540_v42  ;;  %v668_v49 = vrot.slane %v616_v36, %v667_v45 }
  0x89   : > { %v679_v54 = vrot.slane %v616_v36, %v678_v47  ;;  %v690_v59 = vrot.slane %v616_v36, %v689_v50  ;;  %v701_v62 = vrot.slane %v616_v36, %v700_v52  ;;  %v712_v0 = vrot.slane %v616_v36, %v711_v55 }
  0x8a   : > { %648 = vbcast.lane.b32.xlu0 %v646_v37, 256  ;;  %637 = vbcast.lane.b32.xlu1 %v635_v38, 256 }
  0x8b   : > { %v617_v39 = vpop.trf.xlu0 }
  0x8c   : > { %v723_v40 = vrot.slane %v617_v39, %v1319_v16  ;;  %v734_v41 = vrot.slane %v617_v39, %v1533_v35  ;;  %v745_v43 = vrot.slane %v617_v39, %v1540_v42  ;;  %v756_v46 = vrot.slane %v617_v39, %v667_v45 }
  0x8d   : > { %v767_v48 = vrot.slane %v617_v39, %v678_v47  ;;  %v778_v51 = vrot.slane %v617_v39, %v689_v50  ;;  %v789_v53 = vrot.slane %v617_v39, %v700_v52  ;;  %v800_v56 = vrot.slane %v617_v39, %v711_v55 }
  0x8e   : > { %641 = vbcast.lane.b32.xlu1 %v635_v38, 264  ;;  %725 = vbcast.lane.b32.xlu0 %v723_v40, 256 }
  0x8f   : > { %v618_v57 = vpop.trf.xlu0 }
  0x90   : > { %v811_v58 = vrot.slane %v618_v57, %v1319_v16  ;;  %v822_v60 = vrot.slane %v618_v57, %v1533_v35  ;;  %v833_v61 = vrot.slane %v618_v57, %v1540_v42  ;;  %v844_v9 = vrot.slane %v618_v57, %v667_v45 }
  0x91   : > { %v855_v63 = vrot.slane %v618_v57, %v678_v47  ;;  %v866_v1 = vrot.slane %v618_v57, %v689_v50  ;;  %v877_v2 = vrot.slane %v618_v57, %v700_v52  ;;  %v888_v3 = vrot.slane %v618_v57, %v711_v55 }
  0x92   : > { %652 = vbcast.lane.b32.xlu1 %v646_v37, 264  ;;  %736 = vbcast.lane.b32.xlu0 %v734_v41, 256 }
  0x93   : > { %v619_v4 = vpop.trf.xlu0 }
  0x94   : > { %v899_v5 = vrot.slane %v619_v4, %v1319_v16  ;;  %v910_v6 = vrot.slane %v619_v4, %v1533_v35  ;;  %v921_v7 = vrot.slane %v619_v4, %v1540_v42  ;;  %v932_v8 = vrot.slane %v619_v4, %v667_v45 }
  0x95   : > { %v943_v10 = vrot.slane %v619_v4, %v678_v47  ;;  %v954_v11 = vrot.slane %v619_v4, %v689_v50  ;;  %v965_v16 = vrot.slane %v619_v4, %v700_v52  ;;  %v976_v12 = vrot.slane %v619_v4, %v711_v55 }
  0x96   : > { %659 = vbcast.lane.b32.xlu1 %v657_v44, 256  ;;  %747 = vbcast.lane.b32.xlu0 %v745_v43, 256 }
  0x9a   : > { %663 = vbcast.lane.b32.xlu1 %v657_v44, 264  ;;  %758 = vbcast.lane.b32.xlu0 %v756_v46, 256 }
  0x9e   : > { %670 = vbcast.lane.b32.xlu1 %v668_v49, 256  ;;  %769 = vbcast.lane.b32.xlu0 %v767_v48, 256 }
  0xa2   : > { %674 = vbcast.lane.b32.xlu1 %v668_v49, 264  ;;  %780 = vbcast.lane.b32.xlu0 %v778_v51, 256 }
  0xa6   : > { %681 = vbcast.lane.b32.xlu1 %v679_v54, 256  ;;  %791 = vbcast.lane.b32.xlu0 %v789_v53, 256 }
  0xaa   : > { %685 = vbcast.lane.b32.xlu1 %v679_v54, 264  ;;  %802 = vbcast.lane.b32.xlu0 %v800_v56, 256 }
  0xae   : > { %692 = vbcast.lane.b32.xlu1 %v690_v59, 256  ;;  %813 = vbcast.lane.b32.xlu0 %v811_v58, 256 }
  0xb2   : > { %696 = vbcast.lane.b32.xlu1 %v690_v59, 264  ;;  %824 = vbcast.lane.b32.xlu0 %v822_v60, 256 }
  0xb6   : > { %703 = vbcast.lane.b32.xlu1 %v701_v62, 256  ;;  %835 = vbcast.lane.b32.xlu0 %v833_v61, 256 }
  0xba   : > { %707 = vbcast.lane.b32.xlu1 %v701_v62, 264  ;;  %846 = vbcast.lane.b32.xlu0 %v844_v9, 256 }
  0xbe   : > { %714 = vbcast.lane.b32.xlu1 %v712_v0, 256  ;;  %857 = vbcast.lane.b32.xlu0 %v855_v63, 256 }
  0xc2   : > { %718 = vbcast.lane.b32.xlu1 %v712_v0, 264  ;;  %868 = vbcast.lane.b32.xlu0 %v866_v1, 256 }
  0xc6   : > { %729 = vbcast.lane.b32.xlu1 %v723_v40, 264  ;;  %879 = vbcast.lane.b32.xlu0 %v877_v2, 256 }
  0xca   : > { %740 = vbcast.lane.b32.xlu1 %v734_v41, 264  ;;  %890 = vbcast.lane.b32.xlu0 %v888_v3, 256 }
  0xce   : > { %751 = vbcast.lane.b32.xlu1 %v745_v43, 264  ;;  %901 = vbcast.lane.b32.xlu0 %v899_v5, 256 }
  0xd2   : > { %762 = vbcast.lane.b32.xlu1 %v756_v46, 264  ;;  %912 = vbcast.lane.b32.xlu0 %v910_v6, 256 }
  0xd6   : > { %773 = vbcast.lane.b32.xlu1 %v767_v48, 264  ;;  %923 = vbcast.lane.b32.xlu0 %v921_v7, 256 }
  0xda   : > { %784 = vbcast.lane.b32.xlu1 %v778_v51, 264  ;;  %934 = vbcast.lane.b32.xlu0 %v932_v8, 256 }
  0xde   : > { %795 = vbcast.lane.b32.xlu1 %v789_v53, 264  ;;  %945 = vbcast.lane.b32.xlu0 %v943_v10, 256 }
  0xe2   : > { %806 = vbcast.lane.b32.xlu1 %v800_v56, 264  ;;  %956 = vbcast.lane.b32.xlu0 %v954_v11, 256 }
  0xe6   : > { %817 = vbcast.lane.b32.xlu1 %v811_v58, 264  ;;  %967 = vbcast.lane.b32.xlu0 %v965_v16, 256 }
  0xea   : > { %828 = vbcast.lane.b32.xlu1 %v822_v60, 264  ;;  %978 = vbcast.lane.b32.xlu0 %v976_v12, 256 }
  0xee   : > { %839 = vbcast.lane.b32.xlu1 %v833_v61, 264 }
  0xf2   : > { %850 = vbcast.lane.b32.xlu1 %v844_v9, 264 }
  0xf6   : > { %861 = vbcast.lane.b32.xlu1 %v855_v63, 264 }
  0xfa   : > { %872 = vbcast.lane.b32.xlu1 %v866_v1, 264 }
  0xfc   : > { %v649_v13 = vpop.permute.xlu0 %648  ;;  %v638_v14 = vpop.permute.xlu1 %637 }
  0xfd   : > { %1142 = vst.msk [vmem:[%s1353_s28 + $0x210] sm:$0xff] %vm533_vm0, %v649_v13  ;;  %1140 = vst.msk [vmem:[%s1353_s28 + $0x200] sm:$0xff] %vm533_vm0, %v638_v14 }
  0xfe   : > { %883 = vbcast.lane.b32.xlu1 %v877_v2, 264 }
 0x100   : > { %v642_v15 = vpop.permute.xlu1 %641  ;;  %v726_v17 = vpop.permute.xlu0 %725 }
 0x101   : > { %1141 = vst.msk [vmem:[%s1353_s28 + $0x208] sm:$0xff] %vm533_vm0, %v642_v15  ;;  %1156 = vst.msk [vmem:[%s1353_s28 + $0x280] sm:$0xff] %vm533_vm0, %v726_v17 }
 0x102   : > { %894 = vbcast.lane.b32.xlu1 %v888_v3, 264 }
 0x104   : > { %v653_v18 = vpop.permute.xlu1 %652  ;;  %v737_v19 = vpop.permute.xlu0 %736 }
 0x105   : > { %1143 = vst.msk [vmem:[%s1353_s28 + $0x218] sm:$0xff] %vm533_vm0, %v653_v18  ;;  %1158 = vst.msk [vmem:[%s1353_s28 + $0x290] sm:$0xff] %vm533_vm0, %v737_v19 }
 0x106   : > { %905 = vbcast.lane.b32.xlu1 %v899_v5, 264 }
 0x108   : > { %v660_v20 = vpop.permute.xlu1 %659  ;;  %v748_v21 = vpop.permute.xlu0 %747 }
 0x109   : > { %1144 = vst.msk [vmem:[%s1353_s28 + $0x220] sm:$0xff] %vm533_vm0, %v660_v20  ;;  %1160 = vst.msk [vmem:[%s1353_s28 + $0x2a0] sm:$0xff] %vm533_vm0, %v748_v21 }
 0x10a   : > { %916 = vbcast.lane.b32.xlu1 %v910_v6, 264 }
 0x10c   : > { %v664_v22 = vpop.permute.xlu1 %663  ;;  %v759_v23 = vpop.permute.xlu0 %758 }
 0x10d   : > { %1145 = vst.msk [vmem:[%s1353_s28 + $0x228] sm:$0xff] %vm533_vm0, %v664_v22  ;;  %1162 = vst.msk [vmem:[%s1353_s28 + $0x2b0] sm:$0xff] %vm533_vm0, %v759_v23 }
 0x10e   : > { %927 = vbcast.lane.b32.xlu1 %v921_v7, 264 }
 0x110   : > { %v671_v24 = vpop.permute.xlu1 %670  ;;  %v770_v25 = vpop.permute.xlu0 %769 }
 0x111   : > { %1146 = vst.msk [vmem:[%s1353_s28 + $0x230] sm:$0xff] %vm533_vm0, %v671_v24  ;;  %1164 = vst.msk [vmem:[%s1353_s28 + $0x2c0] sm:$0xff] %vm533_vm0, %v770_v25 }
 0x112   : > { %938 = vbcast.lane.b32.xlu1 %v932_v8, 264 }
 0x114   : > { %v675_v26 = vpop.permute.xlu1 %674  ;;  %v781_v27 = vpop.permute.xlu0 %780 }
 0x115   : > { %1147 = vst.msk [vmem:[%s1353_s28 + $0x238] sm:$0xff] %vm533_vm0, %v675_v26  ;;  %1166 = vst.msk [vmem:[%s1353_s28 + $0x2d0] sm:$0xff] %vm533_vm0, %v781_v27 }
 0x116   : > { %949 = vbcast.lane.b32.xlu1 %v943_v10, 264 }
 0x118   : > { %v682_v28 = vpop.permute.xlu1 %681  ;;  %v792_v29 = vpop.permute.xlu0 %791 }
 0x119   : > { %1148 = vst.msk [vmem:[%s1353_s28 + $0x240] sm:$0xff] %vm533_vm0, %v682_v28  ;;  %1168 = vst.msk [vmem:[%s1353_s28 + $0x2e0] sm:$0xff] %vm533_vm0, %v792_v29 }
 0x11a   : > { %960 = vbcast.lane.b32.xlu1 %v954_v11, 264 }
 0x11c   : > { %v686_v30 = vpop.permute.xlu1 %685  ;;  %v803_v31 = vpop.permute.xlu0 %802 }
 0x11d   : > { %1149 = vst.msk [vmem:[%s1353_s28 + $0x248] sm:$0xff] %vm533_vm0, %v686_v30  ;;  %1170 = vst.msk [vmem:[%s1353_s28 + $0x2f0] sm:$0xff] %vm533_vm0, %v803_v31 }
 0x11e   : > { %971 = vbcast.lane.b32.xlu1 %v965_v16, 264 }
 0x120   : > { %v693_v32 = vpop.permute.xlu1 %692  ;;  %v814_v33 = vpop.permute.xlu0 %813 }
 0x121   : > { %1150 = vst.msk [vmem:[%s1353_s28 + $0x250] sm:$0xff] %vm533_vm0, %v693_v32  ;;  %1172 = vst.msk [vmem:[%s1353_s28 + $0x300] sm:$0xff] %vm533_vm0, %v814_v33 }
 0x122   : > { %982 = vbcast.lane.b32.xlu1 %v976_v12, 264 }
 0x124   : > { %v697_v34 = vpop.permute.xlu1 %696  ;;  %v825_v35 = vpop.permute.xlu0 %824 }
 0x125   : > { %1151 = vst.msk [vmem:[%s1353_s28 + $0x258] sm:$0xff] %vm533_vm0, %v697_v34  ;;  %1174 = vst.msk [vmem:[%s1353_s28 + $0x310] sm:$0xff] %vm533_vm0, %v825_v35 }
 0x128   : > { %v704_v36 = vpop.permute.xlu1 %703  ;;  %v836_v37 = vpop.permute.xlu0 %835 }
 0x129   : > { %1152 = vst.msk [vmem:[%s1353_s28 + $0x260] sm:$0xff] %vm533_vm0, %v704_v36  ;;  %1176 = vst.msk [vmem:[%s1353_s28 + $0x320] sm:$0xff] %vm533_vm0, %v836_v37 }
 0x12c   : > { %v708_v38 = vpop.permute.xlu1 %707  ;;  %v847_v39 = vpop.permute.xlu0 %846 }
 0x12d   : > { %1153 = vst.msk [vmem:[%s1353_s28 + $0x268] sm:$0xff] %vm533_vm0, %v708_v38  ;;  %1178 = vst.msk [vmem:[%s1353_s28 + $0x330] sm:$0xff] %vm533_vm0, %v847_v39 }
 0x130   : > { %v715_v40 = vpop.permute.xlu1 %714  ;;  %v858_v41 = vpop.permute.xlu0 %857 }
 0x131   : > { %1154 = vst.msk [vmem:[%s1353_s28 + $0x270] sm:$0xff] %vm533_vm0, %v715_v40  ;;  %1180 = vst.msk [vmem:[%s1353_s28 + $0x340] sm:$0xff] %vm533_vm0, %v858_v41 }
 0x134   : > { %v719_v42 = vpop.permute.xlu1 %718  ;;  %v869_v43 = vpop.permute.xlu0 %868 }
 0x135   : > { %1155 = vst.msk [vmem:[%s1353_s28 + $0x278] sm:$0xff] %vm533_vm0, %v719_v42  ;;  %1182 = vst.msk [vmem:[%s1353_s28 + $0x350] sm:$0xff] %vm533_vm0, %v869_v43 }
 0x138   : > { %v730_v44 = vpop.permute.xlu1 %729  ;;  %v880_v45 = vpop.permute.xlu0 %879 }
 0x139   : > { %1157 = vst.msk [vmem:[%s1353_s28 + $0x288] sm:$0xff] %vm533_vm0, %v730_v44  ;;  %1184 = vst.msk [vmem:[%s1353_s28 + $0x360] sm:$0xff] %vm533_vm0, %v880_v45 }
 0x13c   : > { %v741_v46 = vpop.permute.xlu1 %740  ;;  %v891_v47 = vpop.permute.xlu0 %890 }
 0x13d   : > { %1159 = vst.msk [vmem:[%s1353_s28 + $0x298] sm:$0xff] %vm533_vm0, %v741_v46  ;;  %1186 = vst.msk [vmem:[%s1353_s28 + $0x370] sm:$0xff] %vm533_vm0, %v891_v47 }
 0x140   : > { %v752_v48 = vpop.permute.xlu1 %751  ;;  %v902_v49 = vpop.permute.xlu0 %901 }
 0x141   : > { %1161 = vst.msk [vmem:[%s1353_s28 + $0x2a8] sm:$0xff] %vm533_vm0, %v752_v48  ;;  %1188 = vst.msk [vmem:[%s1353_s28 + $0x380] sm:$0xff] %vm533_vm0, %v902_v49 }
 0x144   : > { %v763_v50 = vpop.permute.xlu1 %762  ;;  %v913_v51 = vpop.permute.xlu0 %912 }
 0x145   : > { %1163 = vst.msk [vmem:[%s1353_s28 + $0x2b8] sm:$0xff] %vm533_vm0, %v763_v50  ;;  %1190 = vst.msk [vmem:[%s1353_s28 + $0x390] sm:$0xff] %vm533_vm0, %v913_v51 }
 0x148   : > { %v774_v52 = vpop.permute.xlu1 %773  ;;  %v924_v53 = vpop.permute.xlu0 %923 }
 0x149   : > { %1165 = vst.msk [vmem:[%s1353_s28 + $0x2c8] sm:$0xff] %vm533_vm0, %v774_v52  ;;  %1192 = vst.msk [vmem:[%s1353_s28 + $0x3a0] sm:$0xff] %vm533_vm0, %v924_v53 }
 0x14c   : > { %v785_v54 = vpop.permute.xlu1 %784  ;;  %v935_v55 = vpop.permute.xlu0 %934 }
 0x14d   : > { %1167 = vst.msk [vmem:[%s1353_s28 + $0x2d8] sm:$0xff] %vm533_vm0, %v785_v54  ;;  %1194 = vst.msk [vmem:[%s1353_s28 + $0x3b0] sm:$0xff] %vm533_vm0, %v935_v55 }
 0x150   : > { %v796_v56 = vpop.permute.xlu1 %795  ;;  %v946_v57 = vpop.permute.xlu0 %945 }
 0x151   : > { %1169 = vst.msk [vmem:[%s1353_s28 + $0x2e8] sm:$0xff] %vm533_vm0, %v796_v56  ;;  %1196 = vst.msk [vmem:[%s1353_s28 + $0x3c0] sm:$0xff] %vm533_vm0, %v946_v57 }
 0x154   : > { %v807_v58 = vpop.permute.xlu1 %806  ;;  %v957_v59 = vpop.permute.xlu0 %956 }
 0x155   : > { %1171 = vst.msk [vmem:[%s1353_s28 + $0x2f8] sm:$0xff] %vm533_vm0, %v807_v58  ;;  %1198 = vst.msk [vmem:[%s1353_s28 + $0x3d0] sm:$0xff] %vm533_vm0, %v957_v59 }
 0x158   : > { %v818_v60 = vpop.permute.xlu1 %817  ;;  %v968_v61 = vpop.permute.xlu0 %967 }
 0x159   : > { %1173 = vst.msk [vmem:[%s1353_s28 + $0x308] sm:$0xff] %vm533_vm0, %v818_v60  ;;  %1200 = vst.msk [vmem:[%s1353_s28 + $0x3e0] sm:$0xff] %vm533_vm0, %v968_v61 }
 0x15c   : > { %v829_v62 = vpop.permute.xlu1 %828  ;;  %v979_v9 = vpop.permute.xlu0 %978 }
 0x15d   : > { %1175 = vst.msk [vmem:[%s1353_s28 + $0x318] sm:$0xff] %vm533_vm0, %v829_v62  ;;  %1202 = vst.msk [vmem:[%s1353_s28 + $0x3f0] sm:$0xff] %vm533_vm0, %v979_v9 }
 0x160   : > { %v840_v63 = vpop.permute.xlu1 %839 }
 0x161   : > { %1177 = vst.msk [vmem:[%s1353_s28 + $0x328] sm:$0xff] %vm533_vm0, %v840_v63 }
 0x164   : > { %v851_v0 = vpop.permute.xlu1 %850 }
 0x165   : > { %1179 = vst.msk [vmem:[%s1353_s28 + $0x338] sm:$0xff] %vm533_vm0, %v851_v0 }
 0x168   : > { %v862_v1 = vpop.permute.xlu1 %861 }
 0x169   : > { %1181 = vst.msk [vmem:[%s1353_s28 + $0x348] sm:$0xff] %vm533_vm0, %v862_v1 }
 0x16c   : > { %v873_v2 = vpop.permute.xlu1 %872 }
 0x16d   : > { %1183 = vst.msk [vmem:[%s1353_s28 + $0x358] sm:$0xff] %vm533_vm0, %v873_v2 }
 0x170   : > { %v884_v3 = vpop.permute.xlu1 %883 }
 0x171   : > { %1185 = vst.msk [vmem:[%s1353_s28 + $0x368] sm:$0xff] %vm533_vm0, %v884_v3 }
 0x174   : > { %v895_v4 = vpop.permute.xlu1 %894 }
 0x175   : > { %1187 = vst.msk [vmem:[%s1353_s28 + $0x378] sm:$0xff] %vm533_vm0, %v895_v4 }
 0x178   : > { %v906_v5 = vpop.permute.xlu1 %905 }
 0x179   : > { %1189 = vst.msk [vmem:[%s1353_s28 + $0x388] sm:$0xff] %vm533_vm0, %v906_v5 }
 0x17c   : > { %v917_v6 = vpop.permute.xlu1 %916 }
 0x17d   : > { %1191 = vst.msk [vmem:[%s1353_s28 + $0x398] sm:$0xff] %vm533_vm0, %v917_v6 }
 0x180   : > { %v928_v7 = vpop.permute.xlu1 %927 }
 0x181   : > { %1193 = vst.msk [vmem:[%s1353_s28 + $0x3a8] sm:$0xff] %vm533_vm0, %v928_v7 }
 0x184   : > { %v939_v8 = vpop.permute.xlu1 %938 }
 0x185   : > { %1195 = vst.msk [vmem:[%s1353_s28 + $0x3b8] sm:$0xff] %vm533_vm0, %v939_v8 }
 0x188   : > { %v950_v10 = vpop.permute.xlu1 %949 }
 0x189   : > { %1197 = vst.msk [vmem:[%s1353_s28 + $0x3c8] sm:$0xff] %vm533_vm0, %v950_v10 }
 0x18c   : > { %v961_v11 = vpop.permute.xlu1 %960 }
 0x18d   : > { %1199 = vst.msk [vmem:[%s1353_s28 + $0x3d8] sm:$0xff] %vm533_vm0, %v961_v11 }
 0x190   : > { %v972_v16 = vpop.permute.xlu1 %971 }
 0x191   : > { %1201 = vst.msk [vmem:[%s1353_s28 + $0x3e8] sm:$0xff] %vm533_vm0, %v972_v16 }
 0x194   : > { %v983_v12 = vpop.permute.xlu1 %982 }
 0x195   : > { %1203 = vst.msk [vmem:[%s1353_s28 + $0x3f8] sm:$0xff] %vm533_vm0, %v983_v12 }
 0x196 PF: > { %s12_s11 = sadd.s32 1, %s1259_s11   ;;  %s1695_s9 = smov %s1255_s10 }
 0x197   : > { %p9_p5 = scmp.ge.s32.totalorder %s12_s11, 4   ;;  %s1696_s10 = smov %s1698_s12 }
 0x199   :  { %11 = sbr.rel (!%p9_p5) target bundleno = 2 (0x2), region = 59 }

</bundles_post_ra>
